<compile_context>
chip_gen: v7x
topology: tpu7x:2x2x1
jax: 0.10.0
libtpu: 0.0.40
codegen_flags: <defaults>
</compile_context>

<pallas_src>
import jax
import jax.numpy as jnp
from jax import lax
from jax.experimental import pallas as pl
from jax.experimental.pallas import tpu as pltpu


def _round_up(a, b):
    return (a + b - 1) // b * b


def _lane_pad_width(w_needed, c):
    """Smallest padded width >= w_needed keeping width*c lane friendly."""
    if 128 % c == 0:                       # make width*c a multiple of 128
        return _round_up(w_needed, 128 // c)
    return _round_up(w_needed, 8)


# ---------------------------------------------------------------------------
# Host-side banded-weight construction (done once, outside the hot path).
# ---------------------------------------------------------------------------
def _band_layer1(w1, w, wi_pad, wo_pad):
    """(3, wi_pad*Cin, wo_pad*Cm).  Input lane-pixel xi = 1-halo padded input
    column; output lane-pixel xo = x + 1 (scratch column).  Zero columns for
    xo outside [1, w] leave the scratch ring / slack untouched by layer 1."""
    cin, cm = w1.shape[2], w1.shape[3]
    xi = jnp.arange(wi_pad)[:, None]
    xo = jnp.arange(wo_pad)[None, :]
    dx = xi - xo + 1                                   # horizontal tap index
    ovalid = (xo >= 1) & (xo <= w)
    sel = jnp.stack([(dx == k) & ovalid for k in range(3)], 0).astype(w1.dtype)
    band = jnp.einsum("kio,dkcm->dicom", sel, w1)      # (3, wi, cin, wo, cm)
    return band.reshape(3, wi_pad * cin, wo_pad * cm)


def _band_layer2(w2, w, wi_pad):
    """(3, wi_pad*Cm, w*Cout).  Input lane-pixel xi = scratch column; output
    lane-pixel xo = x.  Zero rows for xi outside [1, w] implement layer-2's
    width zero padding (so garbage in those scratch lanes never matters)."""
    cm, cout = w2.shape[2], w2.shape[3]
    xi = jnp.arange(wi_pad)[:, None]
    xo = jnp.arange(w)[None, :]
    dx = xi - xo
    ivalid = (xi >= 1) & (xi <= w)
    sel = jnp.stack([(dx == k) & ivalid for k in range(3)], 0).astype(w2.dtype)
    band = jnp.einsum("kio,dkcm->dicom", sel, w2)      # (3, wi, cm, w, cout)
    return band.reshape(3, wi_pad * cm, w * cout)


def prepare_unet_module_params(params, w):
    """Pre-cast / pre-band the weights once (grid-resident in the kernel)."""
    cin = params["w1"].shape[2]
    cm = params["w1"].shape[3]
    cout = params["w2"].shape[3]
    wp = _lane_pad_width(w + 2, cin)       # padded input width (1-px halo)
    we = _lane_pad_width(w + 2, cm)        # padded intermediate width
    return {
        "wb1": _band_layer1(params["w1"], w, wp, we).astype(jnp.bfloat16),
        "b1": jnp.tile(params["b1"], we).reshape(1, we * cm).astype(jnp.float32),
        "wb2": _band_layer2(params["w2"], w, we).astype(jnp.bfloat16),
        "b2": jnp.tile(params["b2"], w).reshape(1, w * cout).astype(jnp.float32),
    }


# ---------------------------------------------------------------------------
# Fused kernel: (conv3x3 + ReLU) x 2 for one batch element, lane-dense.
# ---------------------------------------------------------------------------
def _fused_kernel(x_ref, wb1_ref, b1_ref, wb2_ref, b2_ref, o_ref, h1_ref):
    h = o_ref.shape[1]
    n1 = h1_ref.shape[1]
    n2 = o_ref.shape[2]

    # ---- layer 1: 3 banded MXU matmuls (one per kernel row) + bias + ReLU --
    acc1 = jnp.zeros((h, n1), jnp.float32)
    for dy in range(3):                               # static, unrolled
        acc1 += jnp.dot(x_ref[0, dy:dy + h, :], wb1_ref[dy],
                        preferred_element_type=jnp.float32)
    h1 = jnp.maximum(acc1 + b1_ref[...], 0.0)

    # Zero-padded intermediate in bf16 VMEM scratch.  Rows 0 / h+1 are the
    # layer-2 height padding; width padding is baked into wb2's zero rows.
    zrow = jnp.zeros((1, n1), jnp.bfloat16)
    h1_ref[0:1, :] = zrow
    h1_ref[h + 1:h + 2, :] = zrow
    h1_ref[1:h + 1, :] = h1.astype(jnp.bfloat16)

    # ---- layer 2 -----------------------------------------------------------
    acc2 = jnp.zeros((h, n2), jnp.float32)
    for dy in range(3):
        acc2 += jnp.dot(h1_ref[dy:dy + h, :], wb2_ref[dy],
                        preferred_element_type=jnp.float32)
    o_ref[0] = jnp.maximum(acc2 + b2_ref[...], 0.0).astype(o_ref.dtype)


@jax.jit
def unet_module_forward(x_nchw, kparams):
    """UNetModule.forward: l1 (conv3x3+ReLU) then l2 (conv3x3+ReLU)."""
    wb1, b1, wb2, b2 = kparams["wb1"], kparams["b1"], kparams["wb2"], kparams["b2"]
    n, cin, h, w = x_nchw.shape
    k1, n1 = wb1.shape[1], wb1.shape[2]
    n2 = wb2.shape[2]
    assert k1 % cin == 0 and n2 % w == 0
    wp = k1 // cin
    cout = n2 // w

    # Single fused layout pass: NCHW->NHWC, 1-px halo + lane-alignment pad,
    # fold width into lanes, cast once to bf16 (MXU input precision).
    x = jnp.transpose(x_nchw, (0, 2, 3, 1))
    x = jnp.pad(x, ((0, 0), (1, 1), (1, wp - w - 1), (0, 0)))
    x = x.reshape(n, h + 2, k1).astype(jnp.bfloat16)

    # Explicit scoped-VMEM budget: double-buffered blocks + scratch + headroom.
    blk_bytes = ((h + 2) * k1 * 2 + 3 * k1 * n1 * 2 + n1 * 4
                 + 3 * n1 * n2 * 2 + n2 * 4 + h * n2 * 4)
    vmem_bytes = min(2 * blk_bytes + (h + 2) * n1 * 2 + (4 << 20), 100 << 20)

    y = pl.pallas_call(
        _fused_kernel,
        out_shape=jax.ShapeDtypeStruct((n, h, n2), jnp.float32),
        grid_spec=pltpu.PrefetchScalarGridSpec(
            num_scalar_prefetch=0,
            grid=(n,),
            in_specs=[
                pl.BlockSpec((1, h + 2, k1), lambda i: (i, 0, 0)),   # input
                pl.BlockSpec((3, k1, n1), lambda i: (0, 0, 0)),      # band w1
                pl.BlockSpec((1, n1), lambda i: (0, 0)),             # bias 1
                pl.BlockSpec((3, n1, n2), lambda i: (0, 0, 0)),      # band w2
                pl.BlockSpec((1, n2), lambda i: (0, 0)),             # bias 2
            ],
            out_specs=pl.BlockSpec((1, h, n2), lambda i: (i, 0, 0)),
            scratch_shapes=[pltpu.VMEM((h + 2, n1), jnp.bfloat16)],
        ),
        compiler_params=pltpu.CompilerParams(
            dimension_semantics=("parallel",),
            vmem_limit_bytes=int(vmem_bytes)),
    )(x, wb1, b1, wb2, b2)

    y = y.reshape(n, h, w, cout)
    return jnp.transpose(y, (0, 3, 1, 2))              # NHWC -> NCHW


# ---------------------------------------------------------------------------
# Reference / init / demo
# ---------------------------------------------------------------------------
def init_params(key, in_ch, out_ch):
    """Deterministic init mimicking PyTorch Conv2d default (+/- 1/sqrt(fan_in))."""
    k1, k2, k3, k4 = jax.random.split(key, 4)
    bound1 = 1.0 / jnp.sqrt(in_ch * 9.0)
    bound2 = 1.0 / jnp.sqrt(out_ch * 9.0)
    w1 = jax.random.uniform(k1, (3, 3, in_ch, out_ch), jnp.float32, -bound1, bound1)
    b1 = jax.random.uniform(k2, (out_ch,), jnp.float32, -bound1, bound1)
    w2 = jax.random.uniform(k3, (3, 3, out_ch, out_ch), jnp.float32, -bound2, bound2)
    b2 = jax.random.uniform(k4, (out_ch,), jnp.float32, -bound2, bound2)
    return {"w1": w1, "b1": b1, "w2": w2, "b2": b2}


def _reference_forward(x_nchw, params, quantize_bf16):
    """Pure-JAX reference.  quantize_bf16=True mirrors the kernel's bf16
    matmul inputs (f32 accumulation) for a tight tolerance check."""
    q = (lambda a: a.astype(jnp.bfloat16).astype(jnp.float32)) if quantize_bf16 \
        else (lambda a: a)
    x = jnp.transpose(x_nchw, (0, 2, 3, 1))
    dn = ("NHWC", "HWIO", "NHWC")
    y = lax.conv_general_dilated(q(x), q(params["w1"]), (1, 1), "SAME",
                                 dimension_numbers=dn,
                                 precision=lax.Precision.HIGHEST)
    y = jnp.maximum(y + params["b1"][None, None, None, :], 0.0)
    y = lax.conv_general_dilated(q(y), q(params["w2"]), (1, 1), "SAME",
                                 dimension_numbers=dn,
                                 precision=lax.Precision.HIGHEST)
    y = jnp.maximum(y + params["b2"][None, None, None, :], 0.0)
    return jnp.transpose(y, (0, 3, 1, 2))


if __name__ == "__main__":
    key = jax.random.PRNGKey(0)
    kx, kp = jax.random.split(key)

    N, CIN, COUT, H, W = 2, 4, 8, 16, 16
    x = jax.random.normal(kx, (N, CIN, H, W), jnp.float32)     # PyTorch NCHW
    params = init_params(kp, CIN, COUT)
    kparams = prepare_unet_module_params(params, W)            # once, off hot path

    out = jax.block_until_ready(unet_module_forward(x, kparams))
    assert out.shape == (N, COUT, H, W)

    # Tight check against a reference with the same bf16 matmul-input rounding.
    ref_q = _reference_forward(x, params, True)
    assert jnp.allclose(out, ref_q, atol=2e-3, rtol=2e-3), \
        "mismatch vs bf16-quantized reference"
    # Looser sanity check against the exact f32 PyTorch-equivalent math.
    ref_f = _reference_forward(x, params, False)
    assert jnp.allclose(out, ref_f, atol=5e-2, rtol=5e-2), \
        "mismatch vs f32 reference"

    print("KERNEL_OK")
</pallas_src>

<mosaic_0001>
module attributes {stable_mosaic.version = 11 : i64} {
  func.func @_fused_kernel(%arg0: i32, %arg1: memref<1x18x128xbf16, #tpu.memory_space<vmem>>, %arg2: memref<3x128x256xbf16, #tpu.memory_space<vmem>>, %arg3: memref<1x256xf32, #tpu.memory_space<vmem>>, %arg4: memref<3x256x128xbf16, #tpu.memory_space<vmem>>, %arg5: memref<1x128xf32, #tpu.memory_space<vmem>>, %arg6: memref<1x16x128xf32, #tpu.memory_space<vmem>>, %arg7: memref<18x256xbf16, #tpu.memory_space<vmem>>) attributes {dimension_semantics = [#tpu.dimension_semantics<parallel>], iteration_bounds = array<i64: 2>, scalar_prefetch = 0 : i64, scratch_operands = 1 : i64, tpu.core_type = #tpu.core_type<tc>, window_params = [{transform_indices = @transform_0, window_bounds = array<i64: 1, 18, 128>}, {pipeline_mode = #tpu.pipeline_mode<synchronous>, transform_indices = @transform_1, window_bounds = array<i64: 3, 128, 256>}, {pipeline_mode = #tpu.pipeline_mode<synchronous>, transform_indices = @transform_2, window_bounds = array<i64: 1, 256>}, {pipeline_mode = #tpu.pipeline_mode<synchronous>, transform_indices = @transform_3, window_bounds = array<i64: 3, 256, 128>}, {pipeline_mode = #tpu.pipeline_mode<synchronous>, transform_indices = @transform_4, window_bounds = array<i64: 1, 128>}, {transform_indices = @transform_5, window_bounds = array<i64: 1, 16, 128>}]} {
    %cst = arith.constant 0.000000e+00 : f32
    %0 = vector.broadcast %cst : f32 to vector<16x256xf32>
    %c0 = arith.constant 0 : index
    %c0_0 = arith.constant 0 : index
    %c0_1 = arith.constant 0 : index
    %1 = vector.load %arg1[%c0, %c0_0, %c0_1] : memref<1x18x128xbf16, #tpu.memory_space<vmem>>, vector<1x16x128xbf16>
    %2 = vector.shape_cast %1 : vector<1x16x128xbf16> to vector<16x128xbf16>
    %c0_2 = arith.constant 0 : index
    %c0_3 = arith.constant 0 : index
    %c0_4 = arith.constant 0 : index
    %3 = vector.load %arg2[%c0_2, %c0_3, %c0_4] : memref<3x128x256xbf16, #tpu.memory_space<vmem>>, vector<1x128x256xbf16>
    %4 = vector.shape_cast %3 : vector<1x128x256xbf16> to vector<128x256xbf16>
    %cst_5 = arith.constant dense<0.000000e+00> : vector<16x256xf32>
    %5 = tpu.matmul %2, %4, %cst_5 {dimension_numbers = #tpu.dot_dimension_numbers<[1], [0], [0], [1], [0, 0, 1, 1], [], []>} : vector<16x128xbf16>, vector<128x256xbf16>, vector<16x256xf32> -> vector<16x256xf32>
    %6 = arith.addf %0, %5 : vector<16x256xf32>
    %c0_6 = arith.constant 0 : index
    %c1 = arith.constant 1 : index
    %c0_7 = arith.constant 0 : index
    %7 = vector.load %arg1[%c0_6, %c1, %c0_7] : memref<1x18x128xbf16, #tpu.memory_space<vmem>>, vector<1x16x128xbf16>
    %8 = vector.shape_cast %7 : vector<1x16x128xbf16> to vector<16x128xbf16>
    %c1_8 = arith.constant 1 : index
    %c0_9 = arith.constant 0 : index
    %c0_10 = arith.constant 0 : index
    %9 = vector.load %arg2[%c1_8, %c0_9, %c0_10] : memref<3x128x256xbf16, #tpu.memory_space<vmem>>, vector<1x128x256xbf16>
    %10 = vector.shape_cast %9 : vector<1x128x256xbf16> to vector<128x256xbf16>
    %cst_11 = arith.constant dense<0.000000e+00> : vector<16x256xf32>
    %11 = tpu.matmul %8, %10, %cst_11 {dimension_numbers = #tpu.dot_dimension_numbers<[1], [0], [0], [1], [0, 0, 1, 1], [], []>} : vector<16x128xbf16>, vector<128x256xbf16>, vector<16x256xf32> -> vector<16x256xf32>
    %12 = arith.addf %6, %11 : vector<16x256xf32>
    %c0_12 = arith.constant 0 : index
    %c2 = arith.constant 2 : index
    %c0_13 = arith.constant 0 : index
    %13 = vector.load %arg1[%c0_12, %c2, %c0_13] : memref<1x18x128xbf16, #tpu.memory_space<vmem>>, vector<1x16x128xbf16>
    %14 = vector.shape_cast %13 : vector<1x16x128xbf16> to vector<16x128xbf16>
    %c2_14 = arith.constant 2 : index
    %c0_15 = arith.constant 0 : index
    %c0_16 = arith.constant 0 : index
    %15 = vector.load %arg2[%c2_14, %c0_15, %c0_16] : memref<3x128x256xbf16, #tpu.memory_space<vmem>>, vector<1x128x256xbf16>
    %16 = vector.shape_cast %15 : vector<1x128x256xbf16> to vector<128x256xbf16>
    %cst_17 = arith.constant dense<0.000000e+00> : vector<16x256xf32>
    %17 = tpu.matmul %14, %16, %cst_17 {dimension_numbers = #tpu.dot_dimension_numbers<[1], [0], [0], [1], [0, 0, 1, 1], [], []>} : vector<16x128xbf16>, vector<128x256xbf16>, vector<16x256xf32> -> vector<16x256xf32>
    %18 = arith.addf %12, %17 : vector<16x256xf32>
    %c0_18 = arith.constant 0 : index
    %c0_19 = arith.constant 0 : index
    %19 = vector.load %arg3[%c0_18, %c0_19] : memref<1x256xf32, #tpu.memory_space<vmem>>, vector<1x256xf32>
    %20 = vector.broadcast %19 : vector<1x256xf32> to vector<16x256xf32>
    %21 = arith.addf %18, %20 : vector<16x256xf32>
    %cst_20 = arith.constant 0.000000e+00 : f32
    %22 = vector.broadcast %cst_20 : f32 to vector<16x256xf32>
    %23 = arith.maximumf %21, %22 : vector<16x256xf32>
    %cst_21 = arith.constant 0.000000e+00 : bf16
    %24 = vector.broadcast %cst_21 : bf16 to vector<1x256xbf16>
    %c0_22 = arith.constant 0 : index
    %c0_23 = arith.constant 0 : index
    %25 = vector.load %arg7[%c0_22, %c0_23] : memref<18x256xbf16, #tpu.memory_space<vmem>>, vector<1x256xbf16>
    tpu.vector_store %arg7[%c0_22, %c0_23], %24 {strides = array<i32>} : memref<18x256xbf16, #tpu.memory_space<vmem>>, vector<1x256xbf16>,
    %c17 = arith.constant 17 : index
    %c0_24 = arith.constant 0 : index
    %26 = vector.load %arg7[%c17, %c0_24] : memref<18x256xbf16, #tpu.memory_space<vmem>>, vector<1x256xbf16>
    tpu.vector_store %arg7[%c17, %c0_24], %24 {strides = array<i32>} : memref<18x256xbf16, #tpu.memory_space<vmem>>, vector<1x256xbf16>,
    %27 = arith.truncf %23 : vector<16x256xf32> to vector<16x256xbf16>
    %c1_25 = arith.constant 1 : index
    %c0_26 = arith.constant 0 : index
    %28 = vector.load %arg7[%c1_25, %c0_26] : memref<18x256xbf16, #tpu.memory_space<vmem>>, vector<16x256xbf16>
    tpu.vector_store %arg7[%c1_25, %c0_26], %27 {strides = array<i32>} : memref<18x256xbf16, #tpu.memory_space<vmem>>, vector<16x256xbf16>,
    %cst_27 = arith.constant 0.000000e+00 : f32
    %29 = vector.broadcast %cst_27 : f32 to vector<16x128xf32>
    %c0_28 = arith.constant 0 : index
    %c0_29 = arith.constant 0 : index
    %30 = vector.load %arg7[%c0_28, %c0_29] : memref<18x256xbf16, #tpu.memory_space<vmem>>, vector<16x256xbf16>
    %c0_30 = arith.constant 0 : index
    %c0_31 = arith.constant 0 : index
    %c0_32 = arith.constant 0 : index
    %31 = vector.load %arg4[%c0_30, %c0_31, %c0_32] : memref<3x256x128xbf16, #tpu.memory_space<vmem>>, vector<1x256x128xbf16>
    %32 = vector.shape_cast %31 : vector<1x256x128xbf16> to vector<256x128xbf16>
    %cst_33 = arith.constant dense<0.000000e+00> : vector<16x128xf32>
    %33 = tpu.matmul %30, %32, %cst_33 {dimension_numbers = #tpu.dot_dimension_numbers<[1], [0], [0], [1], [0, 0, 1, 1], [], []>} : vector<16x256xbf16>, vector<256x128xbf16>, vector<16x128xf32> -> vector<16x128xf32>
    %34 = arith.addf %29, %33 : vector<16x128xf32>
    %c1_34 = arith.constant 1 : index
    %c0_35 = arith.constant 0 : index
    %35 = vector.load %arg7[%c1_34, %c0_35] : memref<18x256xbf16, #tpu.memory_space<vmem>>, vector<16x256xbf16>
    %c1_36 = arith.constant 1 : index
    %c0_37 = arith.constant 0 : index
    %c0_38 = arith.constant 0 : index
    %36 = vector.load %arg4[%c1_36, %c0_37, %c0_38] : memref<3x256x128xbf16, #tpu.memory_space<vmem>>, vector<1x256x128xbf16>
    %37 = vector.shape_cast %36 : vector<1x256x128xbf16> to vector<256x128xbf16>
    %cst_39 = arith.constant dense<0.000000e+00> : vector<16x128xf32>
    %38 = tpu.matmul %35, %37, %cst_39 {dimension_numbers = #tpu.dot_dimension_numbers<[1], [0], [0], [1], [0, 0, 1, 1], [], []>} : vector<16x256xbf16>, vector<256x128xbf16>, vector<16x128xf32> -> vector<16x128xf32>
    %39 = arith.addf %34, %38 : vector<16x128xf32>
    %c2_40 = arith.constant 2 : index
    %c0_41 = arith.constant 0 : index
    %40 = vector.load %arg7[%c2_40, %c0_41] : memref<18x256xbf16, #tpu.memory_space<vmem>>, vector<16x256xbf16>
    %c2_42 = arith.constant 2 : index
    %c0_43 = arith.constant 0 : index
    %c0_44 = arith.constant 0 : index
    %41 = vector.load %arg4[%c2_42, %c0_43, %c0_44] : memref<3x256x128xbf16, #tpu.memory_space<vmem>>, vector<1x256x128xbf16>
    %42 = vector.shape_cast %41 : vector<1x256x128xbf16> to vector<256x128xbf16>
    %cst_45 = arith.constant dense<0.000000e+00> : vector<16x128xf32>
    %43 = tpu.matmul %40, %42, %cst_45 {dimension_numbers = #tpu.dot_dimension_numbers<[1], [0], [0], [1], [0, 0, 1, 1], [], []>} : vector<16x256xbf16>, vector<256x128xbf16>, vector<16x128xf32> -> vector<16x128xf32>
    %44 = arith.addf %39, %43 : vector<16x128xf32>
    %c0_46 = arith.constant 0 : index
    %c0_47 = arith.constant 0 : index
    %45 = vector.load %arg5[%c0_46, %c0_47] : memref<1x128xf32, #tpu.memory_space<vmem>>, vector<1x128xf32>
    %46 = vector.broadcast %45 : vector<1x128xf32> to vector<16x128xf32>
    %47 = arith.addf %44, %46 : vector<16x128xf32>
    %cst_48 = arith.constant 0.000000e+00 : f32
    %48 = vector.broadcast %cst_48 : f32 to vector<16x128xf32>
    %49 = arith.maximumf %47, %48 : vector<16x128xf32>
    %c0_49 = arith.constant 0 : index
    %c0_50 = arith.constant 0 : index
    %c0_51 = arith.constant 0 : index
    %50 = vector.load %arg6[%c0_49, %c0_50, %c0_51] : memref<1x16x128xf32, #tpu.memory_space<vmem>>, vector<1x16x128xf32>
    %51 = vector.shape_cast %50 : vector<1x16x128xf32> to vector<16x128xf32>
    %52 = vector.shape_cast %49 : vector<16x128xf32> to vector<1x16x128xf32>
    tpu.vector_store %arg6[%c0_49, %c0_50, %c0_51], %52 {strides = array<i32>} : memref<1x16x128xf32, #tpu.memory_space<vmem>>, vector<1x16x128xf32>,
    return
  }
  func.func @transform_0(%arg0: i32) -> (i32, i32, i32) {
    %c0_i32 = arith.constant 0 : i32
    %c0_i32_0 = arith.constant 0 : i32
    %c0_i32_1 = arith.constant 0 : i32
    return %arg0, %c0_i32, %c0_i32_0 : i32, i32, i32
  }
  func.func @transform_1(%arg0: i32) -> (i32, i32, i32) {
    %c0_i32 = arith.constant 0 : i32
    %c0_i32_0 = arith.constant 0 : i32
    %c0_i32_1 = arith.constant 0 : i32
    %c0_i32_2 = arith.constant 0 : i32
    return %c0_i32, %c0_i32_0, %c0_i32_1 : i32, i32, i32
  }
  func.func @transform_2(%arg0: i32) -> (i32, i32) {
    %c0_i32 = arith.constant 0 : i32
    %c0_i32_0 = arith.constant 0 : i32
    %c0_i32_1 = arith.constant 0 : i32
    return %c0_i32, %c0_i32_0 : i32, i32
  }
  func.func @transform_3(%arg0: i32) -> (i32, i32, i32) {
    %c0_i32 = arith.constant 0 : i32
    %c0_i32_0 = arith.constant 0 : i32
    %c0_i32_1 = arith.constant 0 : i32
    %c0_i32_2 = arith.constant 0 : i32
    return %c0_i32, %c0_i32_0, %c0_i32_1 : i32, i32, i32
  }
  func.func @transform_4(%arg0: i32) -> (i32, i32) {
    %c0_i32 = arith.constant 0 : i32
    %c0_i32_0 = arith.constant 0 : i32
    %c0_i32_1 = arith.constant 0 : i32
    return %c0_i32, %c0_i32_0 : i32, i32
  }
  func.func @transform_5(%arg0: i32) -> (i32, i32, i32) {
    %c0_i32 = arith.constant 0 : i32
    %c0_i32_0 = arith.constant 0 : i32
    %c0_i32_1 = arith.constant 0 : i32
    return %arg0, %c0_i32, %c0_i32_0 : i32, i32, i32
  }
}

</mosaic_0001>

<bundles_post_ra>
// kernel: unet_module_forward.1
= control target key start
LH: loop header
LB: loop body
LE: loop exit
PB: predicated region body
PF: predicated region fallthrough
CT: control target
= control target key end

     0   :  { %10 = vsyncpa [#allocation4], 0  ;;  %s1881_s18 = smov 0   ;;  %s2167_s0 = inlined_call_operand.vmem [shape: bf16[2,18,128], index: 0, kind: input, shape index: {}]   ;;  %s2168_s1 = inlined_call_operand.vmem [shape: bf16[3,128,256], index: 1, kind: input, shape index: {}]   ;;  %s2169_s2 = inlined_call_operand.vmem [shape: f32[1,256], index: 2, kind: input, shape index: {}]   ;;  %s2170_s3 = inlined_call_operand.hbm [shape: bf16[3,256,128], index: 3, kind: input, shape index: {}]   ;;  %s2171_s4 = inlined_call_operand.vmem [shape: f32[1,128], index: 4, kind: input, shape index: {}]   ;;  %s2172_s5 = inlined_call_operand.vmem [shape: f32[2,16,128], index: 5, kind: output, shape index: {}]  }
   0x1 LB: > { %s1887_s19 = sadd.s32 4294967295, %s1845_s18   ;;  %p1432_p0 = scmp.ge.s32.totalorder %s1845_s18, 1  ;;  %s1845_s18 = sphi %s1881_s18, %s16_s18  }
   0x2   : > { %p157_p1 = scmp.lt.s32.totalorder %s1845_s18, 3  ;;  %s1847_s20 = smov [#allocation3]  }
   0x3   : > { %s175_s21 = sshll.u32 %s1847_s20, 4  ;;  %p2173_p3 = scmp.eq.s32.totalorder %s1887_s19, 0  ;;  %s176_s21 = int_to_ptr.vmem [resolvable:$true] %s175_s21 }
   0x4   : > { %p1891_p2 = pnand %p1432_p0, %p157_p1  ;;  %s1807_s26 = scalar_lea.hbm %s2170_s3, 6144 }
   0x5   : > { %p1808_p6 = scmp.ne.s32.totalorder %s2170_s3, %s1807_s26  ;;  %p1814_p10 = scmp.lt.u32.totalorder %s1807_s26, %s2170_s3 }
   0x6   : > { %s2175_s22 = scalar_select %p1891_p2, 1, 0 }
   0x7   : > { %p1664_p4 = pneg %p1891_p2 }
   0x9   : > { %p1900_p5 = pnand %p2173_p3, %p1664_p4 }
   0xb   : > { %p1809_p7 = pneg %p1900_p5 }
   0xd   : > { %p1810_p8 = pnand %p1809_p7, %p1808_p6 }
   0xf   : > { %p1811_p9 = pneg %p1810_p8 }
  0x11   : > { %p1816_p11 = pnand %p1814_p10, %p1811_p9 }
  0x13   : > { %1819 = shalt.err (!%p1816_p11)
}
  0x14   : > { %s1820_s6 = scalar_lea.vmem %s176_s21, 6144  ;;  %p1828_p1 = scmp.lt.s32.totalorder %s176_s21, %s176_s21 }
  0x15   : > { %p1821_p12 = scmp.ne.s32.totalorder %s176_s21, %s1820_s6  ;;  %p1829_p4 = scmp.lt.s32.totalorder %s1820_s6, %s1820_s6 }
  0x17   : > { %p1823_p13 = pnand %p1821_p12, %p1809_p7  ;;  %p1830_p3 = por %p1829_p4, %p1828_p1 }
  0x19   : > { %p1824_p0 = pneg %p1823_p13 }
  0x1b   : > { %p1831_p2 = pnand %p1830_p3, %p1824_p0 }
  0x1d   : > { %1834 = shalt.err (!%p1831_p2)
}
  0x1e   : > { %s1848_s7 = smov 64   ;;  %s1849_s8 = smov 4  }
  0x1f   : > { %1667 = dma.hbm_to_vmem [thread:$0]  (!%p1900_p5), %s2170_s3, 6144, %s176_s21, [#allocation4], %s1848_s7, %s1848_s7, %s1849_s8  }
  0x20   : > { %p2177_p6 = scmp.ne.s32.totalorder %s2175_s22, 0 }
  0x21   : > { %p2178_p8 = scmp.eq.s32.totalorder (!%p2177_p6), %s1887_s19, 0 }
  0x22   : > { %202 = sbr.rel (%p2177_p6) target bundleno = 671 (0x29f), region = 40 }
  0x29   : > { %1840 = dma.done.wait (%p2178_p8), [#allocation4], 6144   ;;  %p2179_p7 = pmov %p2178_p8 }
  0x2a   : > { %v1850_v0 = vmov 0   ;;  %p230_p2 = scmp.lt.s32.totalorder %s1887_s19, 1  ;;  %v1682_v1 = vld [vmem:[%s2168_s1 + $0x84] ss:$8 sps:$4 sm:$0xff]   ;;  %v1684_v2 = vld [vmem:[%s2168_s1 + $0x80] ss:$8 sps:$4 sm:$0xff]  }
  0x2b   : > { %1842 = vsyncadd (%p2179_p7), [#allocation4], 4294961152  ;;  %411 = vmatprep.mubr.bf16.mxu0 %v1850_v0  ;;  %379 = vmatprep.subr.bf16.mxu0 %v1682_v1  ;;  %v1685_v3 = vld [vmem:[%s2168_s1 + $0x94] ss:$8 sps:$4 sm:$0xff]   ;;  %v1687_v4 = vld [vmem:[%s2168_s1 + $0x90] ss:$8 sps:$4 sm:$0xff]  }
  0x2c   : > { %s2189_s19 = smov (!%p230_p2, %s1887_s19), 1  ;;  %380 = vmatpush1.bf16.msra.mxu0 %v1684_v2  ;;  %v1688_v5 = vld [vmem:[%s2168_s1 + $0xa4] ss:$8 sps:$4 sm:$0xff]   ;;  %v1690_v6 = vld [vmem:[%s2168_s1 + $0xa0] ss:$8 sps:$4 sm:$0xff]   ;;  %vm567_vm1 = vcmask 1046528  }
  0x2d   : > { %381 = vmatprep.subr.bf16.mxu0 %v1685_v3  ;;  %s1659_s23 = smul.u32 12, %s2189_s19  ;;  %v1691_v7 = vld [vmem:[%s2168_s1 + $0xb4] ss:$8 sps:$4 sm:$0xff]   ;;  %v1693_v8 = vld [vmem:[%s2168_s1 + $0xb0] ss:$8 sps:$4 sm:$0xff]   ;;  %vm719_vm2 = vcmask 1040384  }
  0x2e   : > { %v1694_v9 = vld [vmem:[%s2168_s1 + $0xc4] ss:$8 sps:$4 sm:$0xff]   ;;  %v1696_v12 = vld [vmem:[%s2168_s1 + $0xc0] ss:$8 sps:$4 sm:$0xff]   ;;  %v1697_v14 = vld [vmem:[%s2168_s1 + $0xd4] ss:$8 sps:$4 sm:$0xff]  }
  0x2f   : > { %s1956_s30 = scalar_lea.vmem %s2167_s0, %s1659_s23  ;;  %v1699_v15 = vld [vmem:[%s2168_s1 + $0xd0] ss:$8 sps:$4 sm:$0xff]   ;;  %v1700_v18 = vld [vmem:[%s2168_s1 + $0xe4] ss:$8 sps:$4 sm:$0xff]   ;;  %v1702_v19 = vld [vmem:[%s2168_s1 + $0xe0] ss:$8 sps:$4 sm:$0xff]  }
  0x30   : > { %382 = vmatpush1.bf16.msra.mxu0 %v1687_v4  ;;  %v241_v10 = vld [vmem:[%s1956_s30] sm:$0xf]  ;;  %v242_v11 = vld [vmem:[%s1956_s30 + $0x4] sm:$0xf]  ;;  %v1703_v23 = vld [vmem:[%s2168_s1 + $0xf4] ss:$8 sps:$4 sm:$0xff]  }
  0x31   : > { %383 = vmatprep.subr.bf16.mxu0 %v1688_v5  ;;  %v1969_v13 = vcombine.low %v241_v10, %v242_v11  ;;  %v1710_v16 = vld [vmem:[%s1956_s30 + $0x8] ss:$0 sps:$4 sm:$0x11]   ;;  %v1705_v24 = vld [vmem:[%s2168_s1 + $0xf0] ss:$8 sps:$4 sm:$0xff]   ;;  %vm722_vm4 = vcmask 1044484  }
  0x32   : > { %v294_v22 = vshll.u32 %v1710_v16, 16  ;;  %v1708_v27 = vld [vmem:[%s2168_s1 + $0x4] ss:$8 sps:$4 sm:$0xff]   ;;  %vm285_vm0 = vsmask.f32 7424  ;;  %v569_v32 = vrot.slane %v1710_v16, 1 }
  0x33   : > { %v289_v17 = vshll.u32 %v1969_v13, 16  ;;  %v287_v20 = vshrl.u32 %v1969_v13, 16  ;;  %v1706_v28 = vld [vmem:[%s2168_s1] ss:$8 sps:$4 sm:$0xff]   ;;  %v1713_v30 = vld [vmem:[%s2168_s1 + $0x14] ss:$8 sps:$4 sm:$0xff]  }
  0x34   : > { %384 = vmatpush1.bf16.msra.mxu0 %v1690_v6  ;;  %v296_v26 = vrot.slane %v294_v22, 1  ;;  %v1711_v31 = vld [vmem:[%s2168_s1 + $0x10] ss:$8 sps:$4 sm:$0xff]   ;;  %v1716_v33 = vld [vmem:[%s2168_s1 + $0x24] ss:$8 sps:$4 sm:$0xff]   ;;  %vm769_vm14 = vcmask 1043456  }
  0x35   : > { %385 = vmatprep.subr.bf16.mxu0 %v1691_v7  ;;  %v291_v21 = vrot.slane %v289_v17, 1  ;;  %v546_v34 = vld [vmem:[%s1956_s30] sm:$0xe]  ;;  %v1719_v38 = vld [vmem:[%s2168_s1 + $0x34] ss:$8 sps:$4 sm:$0xff]   ;;  %v1761_v10 = vld [vmem:[#allocation3 + $0xd0] sm:$0xff]  }
  0x36   : > { %v1506_v35 = vcombine.low %v546_v34, %v242_v11  ;;  %v1714_v36 = vld [vmem:[%s2168_s1 + $0x20] ss:$8 sps:$4 sm:$0xff]   ;;  %v1717_v40 = vld [vmem:[%s2168_s1 + $0x30] ss:$8 sps:$4 sm:$0xff]   ;;  %v1722_v41 = vld [vmem:[%s2168_s1 + $0x44] ss:$8 sps:$4 sm:$0xff]  }
  0x37   : > { %v292_v25 = vor.u32 %v291_v21, %v287_v20  ;;  %v1720_v42 = vld [vmem:[%s2168_s1 + $0x40] ss:$8 sps:$4 sm:$0xff]   ;;  %v1725_v43 = vld [vmem:[%s2168_s1 + $0x54] ss:$8 sps:$4 sm:$0xff]   ;;  %v1723_v44 = vld [vmem:[%s2168_s1 + $0x50] ss:$8 sps:$4 sm:$0xff]  }
  0x38   : > { %386 = vmatpush1.bf16.msra.mxu0 %v1693_v8  ;;  %v568_v37 = vrot.slane %v1506_v35, 1  ;;  %v1728_v45 = vld [vmem:[%s2168_s1 + $0x64] ss:$8 sps:$4 sm:$0xff]   ;;  %v1726_v46 = vld [vmem:[%s2168_s1 + $0x60] ss:$8 sps:$4 sm:$0xff]   ;;  %v1757_v1 = vld [vmem:[#allocation3 + $0xc0] sm:$0xff]  }
  0x39   : > { %387 = vmatprep.subr.bf16.mxu0 %v1694_v9  ;;  %v297_v29 = vsel %vm285_vm0, %v292_v25, %v296_v26  ;;  %v1731_v47 = vld [vmem:[%s2168_s1 + $0x74] ss:$8 sps:$4 sm:$0xff]   ;;  %v1729_v48 = vld [vmem:[%s2168_s1 + $0x70] ss:$8 sps:$4 sm:$0xff]   ;;  %v1734_v49 = vld [vmem:[%s2168_s1 + $0x104] ss:$8 sps:$4 sm:$0xff]   ;;  %1585 = vmatprep.subr.bf16.mxu1 %v1757_v1  ;;  %v701_v26 = vlaneseq }
  0x3a   : > { %v570_v39 = vsel %vm567_vm1, %v568_v37, %v569_v32  ;;  %v1732_v50 = vld [vmem:[%s2168_s1 + $0x100] ss:$8 sps:$4 sm:$0xff]   ;;  %v1737_v51 = vld [vmem:[%s2168_s1 + $0x114] ss:$8 sps:$4 sm:$0xff]   ;;  %v1735_v52 = vld [vmem:[%s2168_s1 + $0x110] ss:$8 sps:$4 sm:$0xff]  }
  0x3b   : > { %v1740_v53 = vld [vmem:[%s2168_s1 + $0x124] ss:$8 sps:$4 sm:$0xff]   ;;  %v1738_v54 = vld [vmem:[%s2168_s1 + $0x120] ss:$8 sps:$4 sm:$0xff]   ;;  %v1743_v55 = vld [vmem:[%s2168_s1 + $0x134] ss:$8 sps:$4 sm:$0xff]  }
  0x3c   : > { %388 = vmatpush1.bf16.msra.mxu0 %v1696_v12  ;;  %v1741_v56 = vld [vmem:[%s2168_s1 + $0x130] ss:$8 sps:$4 sm:$0xff]   ;;  %v1746_v57 = vld [vmem:[%s2168_s1 + $0x144] ss:$8 sps:$4 sm:$0xff]   ;;  %v1744_v58 = vld [vmem:[%s2168_s1 + $0x140] ss:$8 sps:$4 sm:$0xff]  }
  0x3d   : > { %389 = vmatprep.subr.bf16.mxu0 %v1697_v14  ;;  %v1749_v59 = vld [vmem:[%s2168_s1 + $0x154] ss:$8 sps:$4 sm:$0xff]   ;;  %v1747_v60 = vld [vmem:[%s2168_s1 + $0x150] ss:$8 sps:$4 sm:$0xff]   ;;  %v1752_v61 = vld [vmem:[%s2168_s1 + $0x164] ss:$8 sps:$4 sm:$0xff]  }
  0x3e   : > { %v1750_v62 = vld [vmem:[%s2168_s1 + $0x160] ss:$8 sps:$4 sm:$0xff]   ;;  %v1755_v63 = vld [vmem:[%s2168_s1 + $0x174] ss:$8 sps:$4 sm:$0xff]   ;;  %vm720_vm3 = vsmask.f32 256 }
  0x3f   : > { %v1758_v2 = vld [vmem:[#allocation3 + $0x80] sm:$0xff]   ;;  %vm723_vm5 = vsmask.f32 4352  ;;  %vm2095_vm6 = vmand %vm719_vm2, %vm720_vm3  ;;  %v1759_v4 = vld [vmem:[#allocation3 + $0xc8] sm:$0xff]   ;;  %vm729_vm8 = vsmask.f32 7938 }
  0x40   : > { %390 = vmatpush1.bf16.msra.mxu0 %v1699_v15  ;;  %1586 = vmatpush3.bf16.msra.mxu1 %v1758_v2  ;;  %v1760_v5 = vld [vmem:[#allocation3 + $0x88] sm:$0xff]   ;;  %vm2100_vm7 = vmand %vm722_vm4, %vm723_vm5  ;;  %vm731_vm9 = vsmask.f32 7954  ;;  %v734_v9 = vld [vmem:[#allocation2 + $0x10] sm:$0x11]  ;;  %vm771_vm15 = vcmask 1047556  }
  0x41   : > { %391 = vmatprep.subr.bf16.mxu0 %v1700_v18  ;;  %v726_v7 = vld [vmem:[#allocation2] sm:$0x11]  ;;  %vm725_vm10 = vmor %vm2100_vm7, %vm2095_vm6  ;;  %1587 = vmatprep.subr.bf16.mxu1 %v1759_v4  ;;  %v1762_v11 = vld [vmem:[#allocation3 + $0x90] sm:$0xff]   ;;  %s1582_s25 = sshll.u32 %s2189_s19, 4 }
  0x42   : > { %v727_v8 = vsel %vm725_vm10, 0, %v726_v7  ;;  %vm730_vm11 = vmand %vm719_vm2, %vm729_vm8  ;;  %v1764_v14 = vld [vmem:[#allocation3 + $0x98] sm:$0xff]   ;;  %v1765_v17 = vld [vmem:[#allocation3 + $0xe0] sm:$0xff]   ;;  %s239_s28 = scalar_lea.vmem %s2172_s5, %s1582_s25 }
  0x43   : > { %728 = vst [vmem:[#allocation2] sm:$0x11] %v727_v8  ;;  %vm732_vm12 = vmand %vm722_vm4, %vm731_vm9  ;;  %v1766_v18 = vld [vmem:[#allocation3 + $0xa0] sm:$0xff]   ;;  %v1768_v20 = vld [vmem:[#allocation3 + $0xa8] sm:$0xff]  }
  0x44   : > { %392 = vmatpush1.bf16.msra.mxu0 %v1702_v19  ;;  %1588 = vmatpush3.bf16.msra.mxu1 %v1760_v5  ;;  %vm733_vm13 = vmor %vm732_vm12, %vm730_vm11  ;;  %v1767_v19 = vld [vmem:[#allocation3 + $0xe8] sm:$0xff]   ;;  %v1769_v21 = vld [vmem:[#allocation3 + $0xf0] sm:$0xff]  }
  0x45   : > { %393 = vmatprep.subr.bf16.mxu0 %v1703_v23  ;;  %1589 = vmatprep.subr.bf16.mxu1 %v1761_v10  ;;  %v735_v12 = vsel %vm733_vm13, 0, %v734_v9  ;;  %vm2117_vm5 = vmand %vm769_vm14, %vm729_vm8  ;;  %v1770_v22 = vld [vmem:[#allocation3 + $0xb0] sm:$0xff]   ;;  %v1771_v23 = vld [vmem:[#allocation3 + $0xf8] sm:$0xff]   ;;  %vm747_vm8 = vsmask.f32 4368 }
  0x46   : > { %736 = vst [vmem:[#allocation2 + $0x10] sm:$0x11] %v735_v12  ;;  %vm2122_vm2 = vmand %vm771_vm15, %vm731_vm9  ;;  %v1774_v25 = vld [vmem:[#allocation3 + $0x40] sm:$0xff]  }
  0x47   : > { %vm773_vm4 = vmor %vm2122_vm2, %vm2117_vm5 }
  0x48   : > { %394 = vmatpush1.bf16.msra.mxu0 %v1705_v24  ;;  %1590 = vmatpush3.bf16.msra.mxu1 %v1762_v11  ;;  %v1772_v24 = vld [vmem:[#allocation3 + $0xb8] sm:$0xff]   ;;  %vm748_vm9 = vmor %vm720_vm3, %vm747_vm8 }
  0x49   : > { %503 = vmatprep.subr.bf16.mxu0 %v1708_v27  ;;  %v702_v27 = vshrl.u32 %v701_v26, 7  ;;  %v1780_v26 = vld [vmem:[#allocation3 + $0x10] sm:$0xff]  }
  0x4b   : > { %412 = vmatmul.mubr.bf16.vlgmr.msra.gmra.mrb[0].mxu0 %v297_v29  ;;  %v699_v29 = vld [vmem:[%s2169_s2] sm:$0x3] }
  0x4c   : > { %504 = vmatpush1.bf16.msra.mxu0 %v1706_v28  ;;  %535 = vmatprep.mubr.bf16.mxu0 %v1850_v0  ;;  %v703_v28 = vsub.s32 0, %v702_v27 }
  0x4d   : > { %505 = vmatprep.subr.bf16.mxu0 %v1713_v30  ;;  %v707_v30 = vsub.s32 1, %v702_v27  ;;  %v1781_v27 = vld [vmem:[#allocation3 + $0x58] sm:$0xff]  }
  0x4f   : > { %v708_v32 = vrot.slane %v699_v29, %v707_v30  ;;  %v1784_v30 = vld [vmem:[#allocation3 + $0x20] sm:$0xff]  }
  0x50   : > { %506 = vmatpush1.bf16.msra.mxu0 %v1711_v31  ;;  %v704_v31 = vrot.slane %v699_v29, %v703_v28  ;;  %v1782_v28 = vld [vmem:[#allocation3 + $0x18] sm:$0xff]   ;;  %v1783_v29 = vld [vmem:[#allocation3 + $0x60] sm:$0xff]  }
  0x51   : > { %507 = vmatprep.subr.bf16.mxu0 %v1716_v33 }
  0x54   : > { %508 = vmatpush1.bf16.msra.mxu0 %v1714_v36 }
  0x55   : > { %509 = vmatprep.subr.bf16.mxu0 %v1719_v38 }
  0x58   : > { %510 = vmatpush1.bf16.msra.mxu0 %v1717_v40 }
  0x59   : > { %511 = vmatprep.subr.bf16.mxu0 %v1722_v41 }
  0x5c   : > { %512 = vmatpush1.bf16.msra.mxu0 %v1720_v42 }
  0x5d   : > { %513 = vmatprep.subr.bf16.mxu0 %v1725_v43 }
  0x60   : > { %514 = vmatpush1.bf16.msra.mxu0 %v1723_v44 }
  0x61   : > { %515 = vmatprep.subr.bf16.mxu0 %v1728_v45 }
  0x64   : > { %516 = vmatpush1.bf16.msra.mxu0 %v1726_v46 }
  0x65   : > { %517 = vmatprep.subr.bf16.mxu0 %v1731_v47 }
  0x68   : > { %518 = vmatpush1.bf16.msra.mxu0 %v1729_v48 }
  0x69   : > { %652 = vmatprep.subr.bf16.mxu0 %v1734_v49 }
  0x6b   : > { %536 = vmatmul.mubr.bf16.vlgmr.msra.gmra.mrb[0].mxu0 %v1969_v13  ;;  %v1763_v13 = vld [vmem:[#allocation3 + $0xd8] sm:$0xff]  }
  0x6c   : > { %653 = vmatpush1.bf16.msra.mxu0 %v1732_v50  ;;  %684 = vmatprep.mubr.bf16.mxu0 %v1850_v0  ;;  %v1753_v0 = vld [vmem:[%s2168_s1 + $0x170] ss:$8 sps:$4 sm:$0xff]  }
  0x6d   : > { %654 = vmatprep.subr.bf16.mxu0 %v1737_v51  ;;  %1591 = vmatprep.subr.bf16.mxu1 %v1763_v13  ;;  %v774_v51 = vld [vmem:[#allocation2] sm:$0xff] }
  0x6e   : > { %1592 = vmatpush3.bf16.msra.mxu1 %v1764_v14 }
  0x6f   : > { %1593 = vmatprep.subr.bf16.mxu1 %v1765_v17 }
  0x70   : > { %655 = vmatpush1.bf16.msra.mxu0 %v1735_v52 }
  0x71   : > { %656 = vmatprep.subr.bf16.mxu0 %v1740_v53 }
  0x72   : > { %1594 = vmatpush3.bf16.msra.mxu1 %v1766_v18 }
  0x73   : > { %1595 = vmatprep.subr.bf16.mxu1 %v1767_v19 }
  0x74   : > { %657 = vmatpush1.bf16.msra.mxu0 %v1738_v54 }
  0x75   : > { %658 = vmatprep.subr.bf16.mxu0 %v1743_v55  ;;  %v778_v55 = vld [vmem:[#allocation2 + $0x10] sm:$0x11] }
  0x76   : > { %1596 = vmatpush3.bf16.msra.mxu1 %v1768_v20  ;;  %v1776_v20 = vld [vmem:[#allocation3] sm:$0xff]  }
  0x77   : > { %1597 = vmatprep.subr.bf16.mxu1 %v1769_v21 }
  0x78   : > { %659 = vmatpush1.bf16.msra.mxu0 %v1741_v56 }
  0x79   : > { %660 = vmatprep.subr.bf16.mxu0 %v1746_v57 }
  0x7a   : > { %1598 = vmatpush3.bf16.msra.mxu1 %v1770_v22 }
  0x7b   : > { %1599 = vmatprep.subr.bf16.mxu1 %v1771_v23  ;;  %v1777_v23 = vld [vmem:[#allocation3 + $0x48] sm:$0xff]  }
  0x7c   : > { %661 = vmatpush1.bf16.msra.mxu0 %v1744_v58 }
  0x7d   : > { %662 = vmatprep.subr.bf16.mxu0 %v1749_v59 }
  0x7e   : > { %1600 = vmatpush3.bf16.msra.mxu1 %v1772_v24  ;;  %v1778_v24 = vld [vmem:[#allocation3 + $0x8] sm:$0xff]  }
  0x7f   : > { %1607 = vmatprep.subr.bf16.mxu1 %v1774_v25  ;;  %v1779_v25 = vld [vmem:[#allocation3 + $0x50] sm:$0xff]  }
  0x80   : > { %663 = vmatpush1.bf16.msra.mxu0 %v1747_v60 }
  0x81   : > { %664 = vmatprep.subr.bf16.mxu0 %v1752_v61 }
  0x84   : > { %665 = vmatpush1.bf16.msra.mxu0 %v1750_v62 }
  0x85   : > { %666 = vmatprep.subr.bf16.mxu0 %v1755_v63 }
  0x88   : > { %667 = vmatpush1.bf16.msra.mxu0 %v1753_v0 }
  0x8b   : > { %685 = vmatmul.mubr.bf16.vlgmr.msra.gmra.mrb[0].mxu0 %v570_v39 }
 0x15e   : > { %v686_v33 = vpop.f32.mrb[0].mxu0 }
 0x15f   : > { %v711_v34 = vadd.f32 %v704_v31, %v686_v33  ;;  %v688_v35 = vpop.f32.mrb[1].mxu0  ;;  %v1787_v33 = vld [vmem:[#allocation3 + $0x70] sm:$0xff]  }
 0x160   : > { %v712_v36 = vadd.f32 %v708_v32, %v688_v35  ;;  %v690_v37 = vpop.f32.mrb[2].mxu0  ;;  %v1789_v35 = vld [vmem:[#allocation3 + $0x78] sm:$0xff]  }
 0x161   : > { %v715_v38 = vmax.f32 %v711_v34, 0.0  ;;  %v713_v39 = vadd.f32 %v704_v31, %v690_v37  ;;  %v692_v40 = vpop.f32.mrb[3].mxu0  ;;  %v1785_v31 = vld [vmem:[#allocation3 + $0x68] sm:$0xff]   ;;  %v1788_v34 = vld [vmem:[#allocation3 + $0x30] sm:$0xff]   ;;  %v1791_v37 = vld [vmem:[#allocation3 + $0x140] sm:$0xff]  }
 0x162   : > { %v716_v41 = vmax.f32 %v712_v36, 0.0  ;;  %v714_v42 = vadd.f32 %v708_v32, %v692_v40  ;;  %v1786_v32 = vld [vmem:[#allocation3 + $0x28] sm:$0xff]   ;;  %v1790_v36 = vld [vmem:[#allocation3 + $0x38] sm:$0xff]   ;;  %v1792_v40 = vld [vmem:[#allocation3 + $0x100] sm:$0xff]  }
 0x163   : > { %v717_v43 = vmax.f32 %v713_v39, 0.0 }
 0x164   : > { %v1583_v44 = vpack.c.bf16 %v716_v41, %v715_v38  ;;  %v718_v45 = vmax.f32 %v714_v42, 0.0  ;;  %v1793_v42 = vld [vmem:[#allocation3 + $0x148] sm:$0xff]  }
 0x166   : > { %v750_v46 = vshrl.u32 %v1583_v44, 16  ;;  %v1584_v47 = vpack.c.bf16 %v718_v45, %v717_v43  ;;  %v753_v49 = vshll.u32 %v1583_v44, 16  ;;  %v1794_v44 = vld [vmem:[#allocation3 + $0x108] sm:$0xff]   ;;  %v1795_v45 = vld [vmem:[#allocation3 + $0x150] sm:$0xff]  }
 0x168   : > { %v752_v48 = vrot.slane %v750_v46, 7  ;;  %v758_v50 = vshrl.u32 %v1584_v47, 16  ;;  %v761_v54 = vshll.u32 %v1584_v47, 16  ;;  %v1796_v46 = vld [vmem:[#allocation3 + $0x110] sm:$0xff]   ;;  %v1797_v47 = vld [vmem:[#allocation3 + $0x158] sm:$0xff]  }
 0x16a   : > { %v755_v52 = vor.u32 %v753_v49, %v752_v48  ;;  %v760_v53 = vrot.slane %v758_v50, 7  ;;  %v756_v56 = vrot.slane %v752_v48, 4  ;;  %v1798_v48 = vld [vmem:[#allocation3 + $0x118] sm:$0xff]   ;;  %v1799_v49 = vld [vmem:[#allocation3 + $0x160] sm:$0xff]  }
 0x16b   : > { %v1800_v50 = vld [vmem:[#allocation3 + $0x120] sm:$0xff]  }
 0x16c   : > { %v775_v57 = vsel %vm773_vm4, %v755_v52, %v774_v51  ;;  %v763_v58 = vor.u32 %v761_v54, %v760_v53  ;;  %v765_v59 = vrot.slane %v760_v53, 4  ;;  %v1801_v51 = vld [vmem:[#allocation3 + $0x168] sm:$0xff]   ;;  %v1803_v53 = vld [vmem:[#allocation3 + $0x170] sm:$0xff]  }
 0x16d   : > { %776 = vst [vmem:[#allocation2] sm:$0xff] %v775_v57  ;;  %v1802_v52 = vld [vmem:[#allocation3 + $0x128] sm:$0xff]   ;;  %v1804_v54 = vld [vmem:[#allocation3 + $0x130] sm:$0xff]  }
 0x16e   : > { %v2139_v60 = vsel %vm748_vm9, %v756_v56, %v763_v58  ;;  %v779_v61 = vsel %vm725_vm10, %v765_v59, %v778_v55  ;;  %v1805_v55 = vld [vmem:[#allocation3 + $0x178] sm:$0xff]  }
 0x16f   : > { %780 = vst [vmem:[#allocation2 + $0x10] sm:$0x11] %v779_v61  ;;  %v1526_v62 = vcombine.high %v775_v57, %v2139_v60  ;;  %v1525_v63 = vcombine.low %v775_v57, %v2139_v60  ;;  %v1806_v56 = vld [vmem:[#allocation3 + $0x138] sm:$0xff]  }
 0x171   : > { %v877_v0 = vshll.u32 %v1526_v62, 16  ;;  %v865_v1 = vshll.u32 %v1525_v63, 16  ;;  %v875_v6 = vshrl.u32 %v1526_v62, 16  ;;  %v863_v11 = vshrl.u32 %v1525_v63, 16 }
 0x173   : > { %v879_v7 = vrot.slane %v877_v0, 1  ;;  %v867_v10 = vrot.slane %v865_v1, 1 }
 0x174   : > { %v1164_v2 = vld [vmem:[#allocation2] sm:$0xee] }
 0x175   : > { %v1561_v4 = vcombine.low %v1164_v2, %v2139_v60  ;;  %v880_v15 = vor.u32 %v879_v7, %v875_v6  ;;  %v868_v17 = vor.u32 %v867_v10, %v863_v11  ;;  %v1562_v38 = vcombine.high %v1164_v2, %v2139_v60 }
 0x176   : > { %v815_v5 = vld [vmem:[#allocation2 + $0x10] sm:$0x11] }
 0x177   : > { %v1528_v8 = vcombine.high %v815_v5, %v815_v5  ;;  %v1527_v9 = vcombine.low %v815_v5, %v815_v5  ;;  %v1203_v13 = vrot.slane %v1561_v4, 1  ;;  %v1206_v41 = vrot.slane %v1562_v38, 1 }
 0x179   : > { %v882_v3 = vshll.u32 %v1528_v8, 16  ;;  %v870_v12 = vshll.u32 %v1527_v9, 16  ;;  %v1204_v14 = vrot.slane %v1527_v9, 1  ;;  %v1207_v39 = vrot.slane %v1528_v8, 1 }
 0x17b   : > { %v884_v16 = vrot.slane %v882_v3, 1  ;;  %v872_v18 = vrot.slane %v870_v12, 1  ;;  %v2150_v19 = vsel %vm567_vm1, %v1203_v13, %v1204_v14  ;;  %v1208_v43 = vsel %vm567_vm1, %v1206_v41, %v1207_v39  ;;  %v1579_v3 = vld [vmem:[%s2171_s4] ss:$0 sm:$0xff] }
 0x17d   : > { %v885_v21 = vsel %vm285_vm0, %v880_v15, %v884_v16  ;;  %v873_v22 = vsel %vm285_vm0, %v868_v17, %v872_v18 }
 0x17e   : > { %1016 = vmatprep.mubr.bf16.mxu1 %v885_v21 }
 0x17f   : > { %1017 = vmatmul.mubr.bf16.vlgmr.msra.gmra.mrb[0].mxu1 %v873_v22 }
 0x180   : > { %1608 = vmatpush3.bf16.msra.mxu1 %v1776_v20  ;;  %1155 = vmatprep.mubr.bf16.mxu1 %v1526_v62 }
 0x181   : > { %1609 = vmatprep.subr.bf16.mxu1 %v1777_v23 }
 0x184   : > { %1610 = vmatpush3.bf16.msra.mxu1 %v1778_v24 }
 0x185   : > { %1611 = vmatprep.subr.bf16.mxu1 %v1779_v25 }
 0x188   : > { %1612 = vmatpush3.bf16.msra.mxu1 %v1780_v26 }
 0x189   : > { %1613 = vmatprep.subr.bf16.mxu1 %v1781_v27 }
 0x18c   : > { %1614 = vmatpush3.bf16.msra.mxu1 %v1782_v28 }
 0x18d   : > { %1615 = vmatprep.subr.bf16.mxu1 %v1783_v29 }
 0x190   : > { %1616 = vmatpush3.bf16.msra.mxu1 %v1784_v30 }
 0x191   : > { %1617 = vmatprep.subr.bf16.mxu1 %v1785_v31 }
 0x194   : > { %1618 = vmatpush3.bf16.msra.mxu1 %v1786_v32 }
 0x195   : > { %1619 = vmatprep.subr.bf16.mxu1 %v1787_v33 }
 0x198   : > { %1620 = vmatpush3.bf16.msra.mxu1 %v1788_v34 }
 0x199   : > { %1621 = vmatprep.subr.bf16.mxu1 %v1789_v35 }
 0x19c   : > { %1622 = vmatpush3.bf16.msra.mxu1 %v1790_v36 }
 0x19d   : > { %1629 = vmatprep.subr.bf16.mxu1 %v1791_v37 }
 0x19f   : > { %1156 = vmatmul.mubr.bf16.vlgmr.msra.gmra.mrb[4].mxu1 %v1525_v63 }
 0x1a0   : > { %1630 = vmatpush3.bf16.msra.mxu1 %v1792_v40  ;;  %1339 = vmatprep.mubr.bf16.mxu1 %v1208_v43 }
 0x1a1   : > { %1631 = vmatprep.subr.bf16.mxu1 %v1793_v42 }
 0x1a4   : > { %1632 = vmatpush3.bf16.msra.mxu1 %v1794_v44 }
 0x1a5   : > { %1633 = vmatprep.subr.bf16.mxu1 %v1795_v45 }
 0x1a8   : > { %1634 = vmatpush3.bf16.msra.mxu1 %v1796_v46 }
 0x1a9   : > { %1635 = vmatprep.subr.bf16.mxu1 %v1797_v47 }
 0x1ac   : > { %1636 = vmatpush3.bf16.msra.mxu1 %v1798_v48 }
 0x1ad   : > { %1637 = vmatprep.subr.bf16.mxu1 %v1799_v49 }
 0x1b0   : > { %1638 = vmatpush3.bf16.msra.mxu1 %v1800_v50 }
 0x1b1   : > { %1639 = vmatprep.subr.bf16.mxu1 %v1801_v51 }
 0x1b4   : > { %1640 = vmatpush3.bf16.msra.mxu1 %v1802_v52 }
 0x1b5   : > { %1641 = vmatprep.subr.bf16.mxu1 %v1803_v53 }
 0x1b8   : > { %1642 = vmatpush3.bf16.msra.mxu1 %v1804_v54 }
 0x1b9   : > { %1643 = vmatprep.subr.bf16.mxu1 %v1805_v55 }
 0x1bc   : > { %1644 = vmatpush3.bf16.msra.mxu1 %v1806_v56 }
 0x1bf   : > { %1340 = vmatmul.mubr.bf16.vlgmr.msra.gmra.mrb[8].mxu1 %v2150_v19 }
 0x252   : > { %v1601_v57 = vpop.f32.mrb[0].mxu1 }
 0x253   : > { %v1602_v58 = vpop.f32.mrb[1].mxu1 }
 0x254   : > { %v1603_v59 = vadd.f32 %v1602_v58, %v1601_v57  ;;  %v1604_v60 = vpop.f32.mrb[2].mxu1 }
 0x255   : > { %v1605_v61 = vpop.f32.mrb[3].mxu1 }
 0x256   : > { %v1606_v62 = vadd.f32 %v1605_v61, %v1604_v60 }
 0x272   : > { %v1623_v63 = vpop.f32.mrb[4].mxu1 }
 0x273   : > { %v1624_v0 = vpop.f32.mrb[5].mxu1 }
 0x274   : > { %v1625_v1 = vadd.f32 %v1624_v0, %v1623_v63  ;;  %v1626_v2 = vpop.f32.mrb[6].mxu1 }
 0x275   : > { %v1627_v4 = vpop.f32.mrb[7].mxu1 }
 0x276   : > { %v1158_v5 = vadd.f32 %v1625_v1, %v1603_v59  ;;  %v1628_v7 = vadd.f32 %v1627_v4, %v1626_v2 }
 0x278   : > { %v1161_v8 = vadd.f32 %v1628_v7, %v1606_v62 }
 0x292   : > { %v1645_v9 = vpop.f32.mrb[8].mxu1 }
 0x293   : > { %v1646_v10 = vpop.f32.mrb[9].mxu1 }
 0x294   : > { %v1647_v6 = vadd.f32 %v1646_v10, %v1645_v9  ;;  %v1648_v11 = vpop.f32.mrb[10].mxu1 }
 0x295   : > { %v1649_v12 = vpop.f32.mrb[11].mxu1 }
 0x296   : > { %v1348_v13 = vadd.f32 %v1647_v6, %v1158_v5  ;;  %v1650_v14 = vadd.f32 %v1649_v12, %v1648_v11 }
 0x298   : > { %v1357_v15 = vadd.f32 %v1579_v3, %v1348_v13  ;;  %v1349_v16 = vadd.f32 %v1650_v14, %v1161_v8 }
 0x29a   : > { %v1359_v17 = vmax.f32 %v1357_v15, 0.0  ;;  %v1358_v18 = vadd.f32 %v1579_v3, %v1349_v16 }
 0x29c   : > { %1361 = vst [vmem:[%s239_s28] sm:$0xff] %v1359_v17  ;;  %v1360_v19 = vmax.f32 %v1358_v18, 0.0 }
 0x29e   : > { %1362 = vst [vmem:[%s239_s28 + $0x8] sm:$0xff] %v1360_v19 }
 0x29f PF: > { %s16_s18 = sadd.s32 1, %s1845_s18  }
 0x2a0   : > { %p13_p3 = scmp.ge.s32.totalorder %s16_s18, 4  }
 0x2a2   :  { %15 = sbr.rel (!%p13_p3) target bundleno = 1 (0x1), region = 79 }
 0x2a9   :  { %1384 = vsyncpa [#allocation4], 1 }
 0x2aa   :  { %1386 = vsyncpa [#allocation4 + $0x1], 1 }

</bundles_post_ra>
